<compile_context>
chip_gen: v5e
topology: v5e:2x2
jax: 0.10.0
libtpu: 0.0.40
codegen_flags: <defaults>
</compile_context>

<pallas_src>
import functools
import numpy as np
import jax
import jax.numpy as jnp
from jax.experimental import pallas as pl
from jax.experimental.pallas import tpu as pltpu


def _round_up(x, m):
    return ((x + m - 1) // m) * m


def _cdiv(a, b):
    return -(-a // b)


def _vmem_capacity_bytes():
    """Physical VMEM of the attached TPU (conservative 64 MiB fallback)."""
    try:
        info = pltpu.get_tpu_info()
        cap = getattr(info, "vmem_capacity_bytes", None)
        if cap:
            return int(cap)
    except Exception:
        pass
    return 64 << 20


def _sine_layer_kernel(x_ref, w_ref, b_ref, o_ref, *, omega_0, compute_dtype):
    # Cast x in-kernel (avoids a separate, unfused HBM convert pass in the
    # wrapper); MXU matmul with f32 accumulation; bias/scale/sin stay f32.
    x = x_ref[...].astype(compute_dtype)
    z = jnp.dot(x, w_ref[...], preferred_element_type=jnp.float32)
    z = z + b_ref[...]                       # (tm, tn) + (1, tn) broadcast
    o_ref[...] = jnp.sin(omega_0 * z).astype(o_ref.dtype)


def sine_layer_forward(x, weight, bias, omega_0=30.0, *,
                       compute_dtype=jnp.bfloat16,
                       out_dtype=None,
                       tile_m=None):
    """x: [..., in_features]; weight: [out_features, in_features] (PyTorch layout);
    bias: [out_features].  Returns sin(omega_0 * (x @ weight.T + bias)).

    out_dtype defaults to compute_dtype (bf16) so successive SIREN layers chain
    without extra casts.  For the *first* SIREN layer (tiny in_f coordinate
    inputs) pass compute_dtype=jnp.float32: that layer is writeback-bound and
    bf16 coords lose precision under the x omega_0 scale.
    """
    orig_shape = x.shape
    in_f = orig_shape[-1]
    out_f = weight.shape[0]
    if out_dtype is None:
        out_dtype = compute_dtype

    x2d = x.reshape(-1, in_f)                # streamed as-is; cast in-kernel
    n = x2d.shape[0]

    # NOTE(perf): under jit with constant weights this transpose/cast/pad folds
    # to a one-off constant; for small-n inference, pre-store W as
    # [in_f, round_up(out_f, 128)] in compute_dtype to skip it entirely.
    w_t = weight.T.astype(compute_dtype)                 # [in_f, out_f]
    b2d = bias.reshape(1, out_f).astype(jnp.float32)

    out_f_p = _round_up(out_f, 128)                      # lane-dense output
    if out_f_p != out_f:
        w_t = jnp.pad(w_t, ((0, 0), (0, out_f_p - out_f)))
        b2d = jnp.pad(b2d, ((0, 0), (0, out_f_p - out_f)))

    # ---- generation-aware VMEM budget ------------------------------------
    vmem_cap = _vmem_capacity_bytes()
    small_vmem = vmem_cap < (96 << 20)       # v7x: 64 MiB; v5e/v6e: 128 MiB
    ws_budget = (26 << 20) if small_vmem else (72 << 20)
    vmem_limit_cap = (40 << 20) if small_vmem else (96 << 20)
    if tile_m is None:
        tile_m = 512 if small_vmem else 1024

    x_isz = jnp.dtype(x2d.dtype).itemsize
    w_isz = jnp.dtype(compute_dtype).itemsize
    o_isz = jnp.dtype(out_dtype).itemsize

    # ---- column tiling: keep the full weight VMEM-resident when it fits ---
    # (grid_n == 1  =>  W / bias are DMA'd exactly once for the whole call).
    if 2 * in_f * out_f_p * w_isz <= ws_budget // 3:
        tn = out_f_p
    else:
        tn = 128
        while 2 * tn <= out_f_p and 2 * in_f * (2 * tn) * w_isz <= ws_budget // 3:
            tn *= 2
    grid_n = _cdiv(out_f_p, tn)

    def _ws_bytes(tm_, w_bufs):
        return (2 * tm_ * in_f * x_isz           # double-buffered x tiles
                + w_bufs * in_f * tn * w_isz     # resident weight tile(s)
                + w_bufs * tn * 4                # bias
                + 2 * tm_ * tn * o_isz)          # double-buffered out tiles

    w_bufs = 1 if grid_n == 1 else 2
    tm = min(tile_m, max(16, _round_up(n, 16)))          # sublane-aligned
    while tm > 128 and _ws_bytes(tm, w_bufs) > ws_budget:
        tm = max(128, _round_up(tm // 2, 16))

    # Pad rows only if a single tile exceeds n; otherwise rely on Pallas'
    # ragged last block (masked writes) instead of a wrapper pad/slice pass.
    n_rows = n
    if n < tm:
        n_rows = tm
        x2d = jnp.pad(x2d, ((0, n_rows - n), (0, 0)))
    grid_m = _cdiv(n_rows, tm)

    # v7x has two TensorCores per chip: give the 'parallel' row axis at least
    # two steps to shard when there is enough work (no effect on v5e/v6e).
    if small_vmem and grid_m == 1 and n_rows >= 256:
        tm = _round_up(_cdiv(n_rows, 2), 16)
        grid_m = _cdiv(n_rows, tm)

    vmem_limit = int(min(max(_ws_bytes(tm, 2) * 3 // 2 + (2 << 20), 16 << 20),
                         vmem_limit_cap))

    kernel = functools.partial(_sine_layer_kernel, omega_0=float(omega_0),
                               compute_dtype=compute_dtype)

    def _build(single_buffer_weights):
        w_mode = {}
        if single_buffer_weights and grid_n == 1 and hasattr(pl, "Buffered"):
            # Weight/bias block index is constant across the whole grid: the
            # block is DMA'd once, so the second pipeline buffer is pure VMEM
            # waste -> single-buffer it.
            w_mode = dict(pipeline_mode=pl.Buffered(1))
        if grid_n == 1:
            grid = (grid_m,)
            in_specs = [
                pl.BlockSpec((tm, in_f), lambda i: (i, 0)),
                pl.BlockSpec((in_f, tn), lambda i: (0, 0), **w_mode),
                pl.BlockSpec((1, tn), lambda i: (0, 0), **w_mode),
            ]
            out_specs = pl.BlockSpec((tm, tn), lambda i: (i, 0))
            dims = ("parallel",)
        else:
            grid = (grid_m, grid_n)
            in_specs = [
                pl.BlockSpec((tm, in_f), lambda i, j: (i, 0)),
                pl.BlockSpec((in_f, tn), lambda i, j: (0, j)),
                pl.BlockSpec((1, tn), lambda i, j: (0, j)),
            ]
            out_specs = pl.BlockSpec((tm, tn), lambda i, j: (i, j))
            dims = ("parallel", "parallel")
        return pl.pallas_call(
            kernel,
            out_shape=jax.ShapeDtypeStruct((n_rows, out_f_p), out_dtype),
            grid=grid,
            in_specs=in_specs,
            out_specs=out_specs,
            compiler_params=pltpu.CompilerParams(
                dimension_semantics=dims, vmem_limit_bytes=vmem_limit),
        )

    try:
        out = _build(True)(x2d, w_t, b2d)
    except Exception:
        if grid_n == 1 and hasattr(pl, "Buffered"):
            # pl.Buffered(1) unsupported on this Mosaic build: fall back to the
            # default double-buffered specs (identical results, slightly more VMEM).
            out = _build(False)(x2d, w_t, b2d)
        else:
            raise

    if n_rows != n:
        out = out[:n]
    if out_f_p != out_f:
        out = out[:, :out_f]
    return out.reshape(*orig_shape[:-1], out_f)


def init_sine_layer_params(key, in_features, out_features,
                           is_first=False, omega_0=30.0):
    """Deterministic SIREN init matching SineLayer.init_weights + nn.Linear bias init."""
    kw, kb = jax.random.split(key)
    if is_first:
        bound_w = 1.0 / in_features
    else:
        bound_w = np.sqrt(6.0 / in_features) / omega_0
    weight = jax.random.uniform(kw, (out_features, in_features),
                                minval=-bound_w, maxval=bound_w,
                                dtype=jnp.float32)
    # nn.Linear default bias init (unchanged by init_weights): U(-1/sqrt(in), 1/sqrt(in))
    bound_b = 1.0 / np.sqrt(in_features)
    bias = jax.random.uniform(kb, (out_features,),
                              minval=-bound_b, maxval=bound_b,
                              dtype=jnp.float32)
    return weight, bias


if __name__ == "__main__":
    key = jax.random.PRNGKey(0)
    k_x, k_p = jax.random.split(key)

    batch, seq, in_features, out_features = 2, 8, 32, 32
    omega_0 = 30.0

    x = jax.random.normal(k_x, (batch, seq, in_features), dtype=jnp.float32)
    weight, bias = init_sine_layer_params(k_p, in_features, out_features,
                                          is_first=False, omega_0=omega_0)

    y = sine_layer_forward(x, weight, bias, omega_0=omega_0)
    y = jax.block_until_ready(y)

    # pure-JAX f32 reference (kernel uses bf16 operands + bf16 output -> relaxed tol)
    y_ref = jnp.sin(omega_0 * (x.reshape(-1, in_features) @ weight.T + bias))
    y_ref = y_ref.reshape(batch, seq, out_features)
    np.testing.assert_allclose(np.asarray(y.astype(jnp.float32)),
                               np.asarray(y_ref), rtol=5e-2, atol=5e-2)
    assert y.shape == (batch, seq, out_features)
    assert y.dtype == jnp.bfloat16

    print("KERNEL_OK")
</pallas_src>

<mosaic_0001>
module attributes {stable_mosaic.version = 11 : i64} {
  func.func @_sine_layer_kernel(%arg0: i32, %arg1: memref<16x32xf32, #tpu.memory_space<vmem>>, %arg2: memref<32x128xbf16, #tpu.memory_space<vmem>>, %arg3: memref<1x128xf32, #tpu.memory_space<vmem>>, %arg4: memref<16x128xbf16, #tpu.memory_space<vmem>>) attributes {dimension_semantics = [#tpu.dimension_semantics<parallel>], iteration_bounds = array<i64: 1>, scalar_prefetch = 0 : i64, scratch_operands = 0 : i64, tpu.core_type = #tpu.core_type<tc>, window_params = [{transform_indices = @transform_0, window_bounds = array<i64: 16, 32>}, {pipeline_mode = #tpu.pipeline_mode<synchronous>, transform_indices = @transform_1, window_bounds = array<i64: 32, 128>}, {pipeline_mode = #tpu.pipeline_mode<synchronous>, transform_indices = @transform_2, window_bounds = array<i64: 1, 128>}, {transform_indices = @transform_3, window_bounds = array<i64: 16, 128>}]} {
    %c0 = arith.constant 0 : index
    %c0_0 = arith.constant 0 : index
    %0 = vector.load %arg1[%c0, %c0_0] : memref<16x32xf32, #tpu.memory_space<vmem>>, vector<16x32xf32>
    %1 = arith.truncf %0 : vector<16x32xf32> to vector<16x32xbf16>
    %c0_1 = arith.constant 0 : index
    %c0_2 = arith.constant 0 : index
    %2 = vector.load %arg2[%c0_1, %c0_2] : memref<32x128xbf16, #tpu.memory_space<vmem>>, vector<32x128xbf16>
    %cst = arith.constant dense<0.000000e+00> : vector<16x128xf32>
    %3 = tpu.matmul %1, %2, %cst {dimension_numbers = #tpu.dot_dimension_numbers<[1], [0], [0], [1], [0, 0, 1, 1], [], []>} : vector<16x32xbf16>, vector<32x128xbf16>, vector<16x128xf32> -> vector<16x128xf32>
    %c0_3 = arith.constant 0 : index
    %c0_4 = arith.constant 0 : index
    %4 = vector.load %arg3[%c0_3, %c0_4] : memref<1x128xf32, #tpu.memory_space<vmem>>, vector<1x128xf32>
    %5 = vector.broadcast %4 : vector<1x128xf32> to vector<16x128xf32>
    %6 = arith.addf %3, %5 : vector<16x128xf32>
    %cst_5 = arith.constant 3.000000e+01 : f32
    %7 = vector.broadcast %cst_5 : f32 to vector<16x128xf32>
    %8 = arith.mulf %7, %6 : vector<16x128xf32>
    %9 = math.sin %8 : vector<16x128xf32>
    %10 = arith.truncf %9 : vector<16x128xf32> to vector<16x128xbf16>
    %c0_6 = arith.constant 0 : index
    %c0_7 = arith.constant 0 : index
    %11 = vector.load %arg4[%c0_6, %c0_7] : memref<16x128xbf16, #tpu.memory_space<vmem>>, vector<16x128xbf16>
    tpu.vector_store %arg4[%c0_6, %c0_7], %10 {strides = array<i32>} : memref<16x128xbf16, #tpu.memory_space<vmem>>, vector<16x128xbf16>,
    return
  }
  func.func @transform_0(%arg0: i32) -> (i32, i32) {
    %c0_i32 = arith.constant 0 : i32
    %c0_i32_0 = arith.constant 0 : i32
    return %arg0, %c0_i32 : i32, i32
  }
  func.func @transform_1(%arg0: i32) -> (i32, i32) {
    %c0_i32 = arith.constant 0 : i32
    %c0_i32_0 = arith.constant 0 : i32
    %c0_i32_1 = arith.constant 0 : i32
    return %c0_i32, %c0_i32_0 : i32, i32
  }
  func.func @transform_2(%arg0: i32) -> (i32, i32) {
    %c0_i32 = arith.constant 0 : i32
    %c0_i32_0 = arith.constant 0 : i32
    %c0_i32_1 = arith.constant 0 : i32
    return %c0_i32, %c0_i32_0 : i32, i32
  }
  func.func @transform_3(%arg0: i32) -> (i32, i32) {
    %c0_i32 = arith.constant 0 : i32
    %c0_i32_0 = arith.constant 0 : i32
    return %arg0, %c0_i32 : i32, i32
  }
}

module attributes {stable_mosaic.version = 11 : i64} {
  func.func @_sine_layer_kernel(%arg0: i32, %arg1: memref<16x32xf32, #tpu.memory_space<vmem>>, %arg2: memref<32x128xbf16, #tpu.memory_space<vmem>>, %arg3: memref<1x128xf32, #tpu.memory_space<vmem>>, %arg4: memref<16x128xbf16, #tpu.memory_space<vmem>>) attributes {dimension_semantics = [#tpu.dimension_semantics<parallel>], iteration_bounds = array<i64: 1>, scalar_prefetch = 0 : i64, scratch_operands = 0 : i64, tpu.core_type = #tpu.core_type<tc>, window_params = [{transform_indices = @transform_0, window_bounds = array<i64: 16, 32>}, {pipeline_mode = #tpu.pipeline_mode<synchronous>, transform_indices = @transform_1, window_bounds = array<i64: 32, 128>}, {pipeline_mode = #tpu.pipeline_mode<synchronous>, transform_indices = @transform_2, window_bounds = array<i64: 1, 128>}, {transform_indices = @transform_3, window_bounds = array<i64: 16, 128>}]} {
    %c0 = arith.constant 0 : index
    %c0_0 = arith.constant 0 : index
    %0 = vector.load %arg1[%c0, %c0_0] : memref<16x32xf32, #tpu.memory_space<vmem>>, vector<16x32xf32>
    %1 = arith.truncf %0 : vector<16x32xf32> to vector<16x32xbf16>
    %c0_1 = arith.constant 0 : index
    %c0_2 = arith.constant 0 : index
    %2 = vector.load %arg2[%c0_1, %c0_2] : memref<32x128xbf16, #tpu.memory_space<vmem>>, vector<32x128xbf16>
    %cst = arith.constant dense<0.000000e+00> : vector<16x128xf32>
    %3 = tpu.matmul %1, %2, %cst {dimension_numbers = #tpu.dot_dimension_numbers<[1], [0], [0], [1], [0, 0, 1, 1], [], []>} : vector<16x32xbf16>, vector<32x128xbf16>, vector<16x128xf32> -> vector<16x128xf32>
    %c0_3 = arith.constant 0 : index
    %c0_4 = arith.constant 0 : index
    %4 = vector.load %arg3[%c0_3, %c0_4] : memref<1x128xf32, #tpu.memory_space<vmem>>, vector<1x128xf32>
    %5 = vector.broadcast %4 : vector<1x128xf32> to vector<16x128xf32>
    %6 = arith.addf %3, %5 : vector<16x128xf32>
    %cst_5 = arith.constant 3.000000e+01 : f32
    %7 = vector.broadcast %cst_5 : f32 to vector<16x128xf32>
    %8 = arith.mulf %7, %6 : vector<16x128xf32>
    %9 = math.sin %8 : vector<16x128xf32>
    %10 = arith.truncf %9 : vector<16x128xf32> to vector<16x128xbf16>
    %c0_6 = arith.constant 0 : index
    %c0_7 = arith.constant 0 : index
    %11 = vector.load %arg4[%c0_6, %c0_7] : memref<16x128xbf16, #tpu.memory_space<vmem>>, vector<16x128xbf16>
    tpu.vector_store %arg4[%c0_6, %c0_7], %10 {strides = array<i32>} : memref<16x128xbf16, #tpu.memory_space<vmem>>, vector<16x128xbf16>,
    return
  }
  func.func @transform_0(%arg0: i32) -> (i32, i32) {
    %c0_i32 = arith.constant 0 : i32
    %c0_i32_0 = arith.constant 0 : i32
    return %arg0, %c0_i32 : i32, i32
  }
  func.func @transform_1(%arg0: i32) -> (i32, i32) {
    %c0_i32 = arith.constant 0 : i32
    %c0_i32_0 = arith.constant 0 : i32
    %c0_i32_1 = arith.constant 0 : i32
    return %c0_i32, %c0_i32_0 : i32, i32
  }
  func.func @transform_2(%arg0: i32) -> (i32, i32) {
    %c0_i32 = arith.constant 0 : i32
    %c0_i32_0 = arith.constant 0 : i32
    %c0_i32_1 = arith.constant 0 : i32
    return %c0_i32, %c0_i32_0 : i32, i32
  }
  func.func @transform_3(%arg0: i32) -> (i32, i32) {
    %c0_i32 = arith.constant 0 : i32
    %c0_i32_0 = arith.constant 0 : i32
    return %arg0, %c0_i32 : i32, i32
  }
}

</mosaic_0001>

<bundles_post_ra>
// kernel: tpu_custom_call.1
= control target key start
LH: loop header
LB: loop body
LE: loop exit
PB: predicated region body
PF: predicated region fallthrough
CT: control target
= control target key end

     0   :  { %8 = vsyncpa [#allocation3], 0  ;;  %s743_s0 = inlined_call_operand.hbm [shape: f32[16,32], index: 0, kind: input, shape index: {}]   ;;  %s744_s1 = inlined_call_operand.hbm [shape: bf16[32,128], index: 1, kind: input, shape index: {}]   ;;  %s745_s2 = inlined_call_operand.vmem [shape: f32[1,128], index: 2, kind: input, shape index: {}]   ;;  %s746_s3 = inlined_call_operand.hbm [shape: bf16[16,128], index: 3, kind: output, shape index: {}]  }
   0x1   :  { %9 = vsyncpa [#allocation6], 0 }
   0x2   :  { %10 = vsyncpa [#allocation4], 0  ;;  %s15_s14 = sshll.u32 %s743_s0, 4  ;;  %s540_s15 = smov [#allocation2]   ;;  %s16_s14 = int_to_ptr.hbm [resolvable:$true] %s15_s14 }
   0x3   :  { %s17_s16 = sshll.u32 %s540_s15, 4  ;;  %s28_s19 = sshll.u32 %s744_s1, 4  ;;  %s18_s16 = int_to_ptr.vmem [resolvable:$true] %s17_s16  ;;  %s29_s19 = int_to_ptr.hbm [resolvable:$true] %s28_s19 }
   0x4   :  { %s541_s20 = smov 128   ;;  %s542_s21 = smov 8  }
   0x5   :  { %23 = dma.hbm_to_vmem [thread:$0]  %s16_s14, 256, %s18_s16, [#allocation3], %s541_s20, %s541_s20, %s542_s21  }
   0x6   :  { %s543_s22 = smov [#allocation5]   ;;  %s544_s24 = smov 64  }
   0x7   :  { %s30_s23 = sshll.u32 %s543_s22, 4  ;;  %s545_s25 = smov 4   ;;  %s31_s23 = int_to_ptr.vmem [resolvable:$true] %s30_s23 }
   0x8   :  { %36 = dma.hbm_to_vmem [thread:$0]  %s29_s19, 256, %s31_s23, [#allocation6], %s544_s24, %s544_s24, %s545_s25  }
   0x9   :  { %534 = dma.done.wait [#allocation3], 256  }
   0xa   :  { %535 = vsyncadd [#allocation3], 4294967040 }
   0xb   :  { %536 = dma.done.wait [#allocation6], 256  }
   0xc   :  { %537 = vsyncadd [#allocation6], 4294967040  ;;  %v441_v0 = vld [vmem:[#allocation5 + $0x8] sm:$0xff]  ;;  %v440_v1 = vld [vmem:[#allocation5] sm:$0xff]  ;;  %vm71_vm0 = vcmask 261120   ;;  %s411_s29 = sshll.u32 %s746_s3, 4  ;;  %s412_s29 = int_to_ptr.hbm [resolvable:$true] %s411_s29 }
   0xd   :  { %81 = vmatpush.bf16.msra.mxu0 %v441_v0  ;;  %v48_v2 = vld [vmem:[#allocation2] sm:$0xff]  ;;  %v49_v3 = vld [vmem:[#allocation2 + $0x8] sm:$0xff]  ;;  %v546_v29 = vmov 683565275   ;;  %v547_v31 = vmov 2475754826  }
   0xe   :  { %v50_v4 = vpack.c.bf16 %v49_v3, %v48_v2  ;;  %v461_v5 = vld [vmem:[%s745_s2] ss:$0 sm:$0xff]  ;;  %v548_v33 = vmov 2131351028   ;;  %v549_v35 = vmov 2102212464  }
   0xf   :  { %v550_v40 = vmov 920167782   ;;  %v551_v43 = vmov 1326507024   ;;  %s553_s2 = smov [#allocation7]  }
  0x10   :  { %s409_s26 = sshll.u32 %s553_s2, 4  ;;  %s410_s26 = int_to_ptr.vmem [resolvable:$true] %s409_s26 }
  0x11   :  { %82 = vmatpush.bf16.msra.mxu0 %v440_v1 }
  0x14   :  { %433 = vmatmul.msk.bf16.vlgmr.msra.gmra.mxu0 %vm71_vm0, %v50_v4 }
  0x91   :  { %v84_v6 = vpop.f32.mrf.mxu0 }
  0x92   :  { %v85_v7 = vadd.f32 %v461_v5, %v84_v6 }
  0x94   :  { %v586_v8 = vmul.f32 30.0, %v85_v7 }
  0x96   :  { %v91_v9 = vand.u32 2147483647, %v586_v8  ;;  %v94_v10 = vand.u32 2139095040, %v586_v8 }
  0x98   :  { %v95_v11 = vshrl.u32 %v94_v10, 23  ;;  %v98_v12 = vand.u32 8388607, %v91_v9 }
  0x99   :  { %v86_v13 = vpop.f32.mrf.mxu0 }
  0x9a   :  { %v434_v14 = vadd.s32 4294967169, %v95_v11  ;;  %v99_v15 = vor.u32 8388608, %v98_v12  ;;  %v87_v16 = vadd.f32 %v461_v5, %v86_v13 }
  0x9c   :  { %v101_v17 = vadd.s32 1, %v434_v14  ;;  %v592_v18 = vmul.f32 30.0, %v87_v16  ;;  %v594_v19 = vshll.u32 %v99_v15, 8 }
  0x9e   :  { %vm102_vm1 = vcmp.gt.s32.totalorder %v101_v17, 0  ;;  %v246_v20 = vand.u32 2147483647, %v592_v18  ;;  %v249_v22 = vand.u32 2139095040, %v592_v18  ;;  %v140_v26 = vand.u32 65535, %v594_v19 }
  0x9f   :  { %v103_v21 = vsel %vm102_vm1, %v101_v17, 0  ;;  %v141_v1 = vshrl.u32 %v594_v19, 16 }
  0xa0   :  { %v105_v23 = vand.u32 31, %v103_v21  ;;  %v104_v24 = vshrl.u32 %v103_v21, 5  ;;  %v250_v27 = vshrl.u32 %v249_v22, 23  ;;  %v253_v28 = vand.u32 8388607, %v246_v20 }
  0xa2   :  { %v106_v25 = vsub.s32 32, %v105_v23  ;;  %v108_v30 = vshll.u32 %v546_v29, %v105_v23  ;;  %v111_v32 = vshll.u32 %v547_v31, %v105_v23  ;;  %v114_v34 = vshll.u32 %v548_v33, %v105_v23 }
  0xa3   :  { %v117_v36 = vshll.u32 %v549_v35, %v105_v23  ;;  %v120_v41 = vshll.u32 %v550_v40, %v105_v23  ;;  %vm123_vm2 = vcmp.lt.s32.totalorder %v104_v24, 1  ;;  %vm124_vm3 = vcmp.lt.s32.totalorder %v104_v24, 2 }
  0xa4   :  { %v109_v37 = vshrl.u32 %v547_v31, %v106_v25  ;;  %v112_v38 = vshrl.u32 %v548_v33, %v106_v25  ;;  %v115_v39 = vshrl.u32 %v549_v35, %v106_v25  ;;  %v118_v42 = vshrl.u32 %v550_v40, %v106_v25 }
  0xa5   :  { %v121_v44 = vshrl.u32 %v551_v43, %v106_v25  ;;  %v437_v48 = vadd.s32 4294967169, %v250_v27  ;;  %v107_v49 = vshrl.u32 %v546_v29, %v106_v25  ;;  %vm126_vm4 = vcmp.lt.s32.totalorder %v104_v24, 4 }
  0xa6   :  { %v110_v45 = vor.u32 %v109_v37, %v108_v30  ;;  %v113_v46 = vor.u32 %v112_v38, %v111_v32  ;;  %v116_v47 = vor.u32 %v115_v39, %v114_v34  ;;  %v119_v50 = vor.u32 %v118_v42, %v117_v36 }
  0xa7   :  { %v122_v51 = vor.u32 %v121_v44, %v120_v41  ;;  %vm125_vm5 = vcmp.lt.s32.totalorder %v104_v24, 3  ;;  %v254_v57 = vor.u32 8388608, %v253_v28  ;;  %v256_v58 = vadd.s32 1, %v437_v48 }
  0xa8   :  { %v128_v52 = vsel %vm126_vm4, %v116_v47, 2102212464  ;;  %v131_v53 = vsel %vm123_vm2, %v110_v45, %v113_v46  ;;  %v135_v54 = vsel %vm123_vm2, %v113_v46, %v116_v47  ;;  %v132_v55 = vsel %vm126_vm4, %v119_v50, 920167782 }
  0xa9   :  { %v136_v56 = vsel %vm126_vm4, %v122_v51, 1326507024  ;;  %v127_v59 = vsel %vm123_vm2, %v107_v49, %v110_v45  ;;  %v129_v60 = vsel %vm125_vm5, %v113_v46, %v128_v52  ;;  %v133_v61 = vsel %vm125_vm5, %v116_v47, %v132_v55 }
  0xaa   :  { %v137_v62 = vsel %vm125_vm5, %v119_v50, %v136_v56  ;;  %v134_v63 = vsel %vm124_vm3, %v131_v53, %v133_v61  ;;  %vm257_vm6 = vcmp.gt.s32.totalorder %v256_v58, 0  ;;  %v619_v6 = vsel %vm124_vm3, %v127_v59, %v129_v60 }
  0xab   :  { %v138_v0 = vsel %vm124_vm3, %v135_v54, %v137_v62  ;;  %v164_v4 = vand.u32 65535, %v134_v63  ;;  %v165_v5 = vshrl.u32 %v134_v63, 16  ;;  %v258_v11 = vsel %vm257_vm6, %v256_v58, 0 }
  0xac   :  { %v142_v2 = vand.u32 65535, %v138_v0  ;;  %v143_v3 = vshrl.u32 %v138_v0, 16  ;;  %v621_v12 = vshll.u32 %v254_v57, 8  ;;  %v260_v34 = vand.u32 31, %v258_v11 }
  0xad   :  { %v167_v15 = vmul.u32 %v165_v5, %v140_v26  ;;  %v168_v16 = vmul.u32 %v164_v4, %v141_v1  ;;  %v166_v22 = vmul.u32 %v164_v4, %v140_v26  ;;  %v169_v23 = vmul.u32 %v165_v5, %v141_v1 }
  0xae   :  { %v145_v7 = vmul.u32 %v143_v3, %v140_v26  ;;  %v146_v10 = vmul.u32 %v142_v2, %v141_v1  ;;  %v144_v13 = vmul.u32 %v142_v2, %v140_v26  ;;  %v147_v14 = vmul.u32 %v143_v3, %v141_v1 }
  0xaf   :  { %v170_v28 = vshll.u32 %v167_v15, 16  ;;  %v171_v30 = vshrl.u32 %v167_v15, 16  ;;  %v172_v32 = vshll.u32 %v168_v16, 16  ;;  %v552_v36 = vmov 0  }
  0xb0   :  { %v148_v17 = vshll.u32 %v145_v7, 16  ;;  %v149_v21 = vshrl.u32 %v145_v7, 16  ;;  %v150_v25 = vshll.u32 %v146_v10, 16  ;;  %v151_v27 = vshrl.u32 %v146_v10, 16 }
  0xb1   :  { %v173_v38 = vshrl.u32 %v168_v16, 16  ;;  %vm174_vm8 = vc.u32 %v166_v22, %v170_v28  ;;  %v176_v39 = vadd.s32 %v170_v28, %v166_v22  ;;  %v625_v26 = vsub.s32 32, %v260_v34 }
  0xb2   :  { %vm152_vm7 = vc.u32 %v144_v13, %v148_v17  ;;  %v154_v24 = vadd.s32 %v148_v17, %v144_v13  ;;  %v175_v42 = vsel %vm174_vm8, 1, %v552_v36  ;;  %v628_v46 = vshrl.u32 %v258_v11, 5 }
  0xb3   :  { %v153_v37 = vsel %vm152_vm7, 1, %v552_v36  ;;  %v177_v45 = vadd.s32 %v175_v42, %v169_v23  ;;  %vm178_vm10 = vc.u32 %v176_v39, %v172_v32  ;;  %v631_v49 = vadd.s32 %v176_v39, %v172_v32 }
  0xb4   :  { %v155_v41 = vadd.s32 %v153_v37, %v147_v14  ;;  %vm156_vm9 = vc.u32 %v154_v24, %v150_v25  ;;  %v179_v48 = vsel %vm178_vm10, 1, %v552_v36  ;;  %v263_v50 = vshll.u32 %v546_v29, %v260_v34 }
  0xb5   :  { %v157_v44 = vsel %vm156_vm9, 1, %v552_v36  ;;  %v181_v51 = vadd.s32 %v179_v48, %v177_v45  ;;  %v264_v52 = vshrl.u32 %v547_v31, %v625_v26  ;;  %v266_v53 = vshll.u32 %v547_v31, %v260_v34 }
  0xb6   :  { %v159_v47 = vadd.s32 %v157_v44, %v155_v41  ;;  %v267_v54 = vshrl.u32 %v548_v33, %v625_v26  ;;  %v269_v56 = vshll.u32 %v548_v33, %v260_v34  ;;  %v270_v57 = vshrl.u32 %v549_v35, %v625_v26 }
  0xb7   :  { %v272_v58 = vshll.u32 %v549_v35, %v260_v34  ;;  %v182_v59 = vadd.s32 %v181_v51, %v171_v30  ;;  %v643_v60 = vor.u32 %v264_v52, %v263_v50  ;;  %v273_v62 = vshrl.u32 %v550_v40, %v625_v26 }
  0xb8   :  { %v160_v55 = vadd.s32 %v159_v47, %v149_v21  ;;  %v645_v61 = vor.u32 %v267_v54, %v266_v53  ;;  %v271_v63 = vor.u32 %v270_v57, %v269_v56  ;;  %v275_v0 = vshll.u32 %v550_v40, %v260_v34 }
  0xb9   :  { %v276_v33 = vshrl.u32 %v551_v43, %v625_v26  ;;  %v183_v1 = vadd.s32 %v182_v59, %v173_v38  ;;  %v274_v2 = vor.u32 %v273_v62, %v272_v58  ;;  %v184_v35 = vmul.u32 %v594_v19, %v619_v6 }
  0xba   :  { %v649_v31 = vadd.s32 %v160_v55, %v151_v27  ;;  %vm278_vm12 = vcmp.lt.s32.totalorder %v628_v46, 1  ;;  %vm281_vm13 = vcmp.lt.s32.totalorder %v628_v46, 4  ;;  %v295_v43 = vand.u32 65535, %v621_v12 }
  0xbb   :  { %v277_v3 = vor.u32 %v276_v33, %v275_v0  ;;  %v187_v4 = vadd.s32 1, %v183_v1  ;;  %v286_v40 = vsel %vm278_vm12, %v643_v60, %v645_v61  ;;  %vm280_vm14 = vcmp.lt.s32.totalorder %v628_v46, 3 }
  0xbc   :  { %vm186_vm11 = vc.u32 %v649_v31, %v631_v49  ;;  %v287_v19 = vsel %vm281_vm13, %v274_v2, 920167782  ;;  %v290_v5 = vsel %vm278_vm12, %v645_v61, %v271_v63  ;;  %vm279_vm15 = vcmp.lt.s32.totalorder %v628_v46, 2 }
  0xbd   :  { %v291_v6 = vsel %vm281_vm13, %v277_v3, 1326507024  ;;  %v188_v7 = vsel %vm186_vm11, %v187_v4, %v183_v1  ;;  %v288_v10 = vsel %vm280_vm14, %v271_v63, %v287_v19  ;;  %v296_v16 = vshrl.u32 %v621_v12, 16 }
  0xbe   :  { %v292_v11 = vsel %vm280_vm14, %v274_v2, %v291_v6  ;;  %v189_v13 = vadd.s32 %v188_v7, %v184_v35  ;;  %v289_v14 = vsel %vm279_vm15, %v286_v40, %v288_v10  ;;  %v283_v39 = vsel %vm281_vm13, %v271_v63, 2102212464 }
  0xbf   :  { %v293_v15 = vsel %vm279_vm15, %v290_v5, %v292_v11  ;;  %v319_v22 = vand.u32 65535, %v289_v14  ;;  %v320_v23 = vshrl.u32 %v289_v14, 16  ;;  %v262_v0 = vshrl.u32 %v546_v29, %v625_v26 }
  0xc0   :  { %v297_v17 = vand.u32 65535, %v293_v15  ;;  %v298_v21 = vshrl.u32 %v293_v15, 16  ;;  %v190_v25 = vadd.s32 536870912, %v189_v13  ;;  %v185_v11 = vadd.s32 %v631_v49, %v649_v31 }
  0xc1   :  { %v322_v24 = vmul.u32 %v320_v23, %v295_v43  ;;  %v323_v32 = vmul.u32 %v319_v22, %v296_v16  ;;  %v321_v47 = vmul.u32 %v319_v22, %v295_v43  ;;  %v324_v51 = vmul.u32 %v320_v23, %v296_v16 }
  0xc2   :  { %v300_v27 = vmul.u32 %v298_v21, %v295_v43  ;;  %v301_v28 = vmul.u32 %v297_v17, %v296_v16  ;;  %v683_v30 = vshrl.u32 %v190_v25, 30  ;;  %v299_v34 = vmul.u32 %v297_v17, %v295_v43 }
  0xc3   :  { %v302_v41 = vmul.u32 %v298_v21, %v296_v16  ;;  %v325_v42 = vshll.u32 %v322_v24, 16  ;;  %v327_v52 = vshll.u32 %v323_v32, 16  ;;  %v326_v3 = vshrl.u32 %v322_v24, 16 }
  0xc4   :  { %v303_v37 = vshll.u32 %v300_v27, 16  ;;  %v192_v38 = vshll.u32 %v683_v30, 30  ;;  %v305_v44 = vshll.u32 %v301_v28, 16  ;;  %v304_v58 = vshrl.u32 %v300_v27, 16 }
  0xc5   :  { %vm329_vm2 = vc.u32 %v321_v47, %v325_v42  ;;  %v331_v54 = vadd.s32 %v325_v42, %v321_v47  ;;  %v306_v33 = vshrl.u32 %v301_v28, 16  ;;  %v282_v40 = vsel %vm278_vm12, %v262_v0, %v643_v60 }
  0xc6   :  { %vm307_vm0 = vc.u32 %v299_v34, %v303_v37  ;;  %v309_v45 = vadd.s32 %v303_v37, %v299_v34  ;;  %v193_v48 = vsub.s32 %v189_v13, %v192_v38  ;;  %v330_v57 = vsel %vm329_vm2, 1, %v552_v36 }
  0xc7   :  { %v308_v50 = vsel %vm307_vm0, 1, %v552_v36  ;;  %v332_v62 = vadd.s32 %v330_v57, %v324_v51  ;;  %vm333_vm4 = vc.u32 %v331_v54, %v327_v52  ;;  %v284_v43 = vsel %vm280_vm14, %v645_v61, %v283_v39 }
  0xc8   :  { %v310_v53 = vadd.s32 %v308_v50, %v302_v41  ;;  %vm311_vm1 = vc.u32 %v309_v45, %v305_v44  ;;  %vm194_vm3 = vcmp.lt.s32.totalorder %v193_v48, 0  ;;  %v195_v55 = vsub.s32 0, %v193_v48 }
  0xc9   :  { %v312_v56 = vsel %vm311_vm1, 1, %v552_v36  ;;  %v334_v1 = vsel %vm333_vm4, 1, %v552_v36  ;;  %v328_v6 = vshrl.u32 %v323_v32, 16  ;;  %v335_v29 = vadd.s32 %v331_v54, %v327_v52 }
  0xca   :  { %v314_v59 = vadd.s32 %v312_v56, %v310_v53  ;;  %v196_v63 = vsel %vm194_vm3, %v195_v55, %v193_v48  ;;  %v336_v4 = vadd.s32 %v334_v1, %v332_v62  ;;  %v285_v36 = vsel %vm279_vm15, %v282_v40, %v284_v43 }
  0xcb   :  { %v197_v2 = vclz %v196_v63  ;;  %v339_v61 = vmul.u32 %v621_v12, %v285_v36  ;;  %vm93_vm7 = vcmp.lt.s32.totalorder %v586_v8, 0  ;;  %vm708_vm9 = vcmp.le.f32.partialorder %v91_v9, 0.7853982 }
  0xcc   :  { %v315_v35 = vadd.s32 %v314_v59, %v304_v58  ;;  %v337_v7 = vadd.s32 %v336_v4, %v326_v3  ;;  %v215_v3 = vsub.s32 4, %v683_v30  ;;  %vm248_vm11 = vcmp.lt.s32.totalorder %v592_v18, 0 }
  0xcd   :  { %v435_v19 = vadd.s32 4294967294, %v197_v2  ;;  %vm721_vm12 = vcmp.le.f32.partialorder %v246_v20, 0.7853982  ;;  %vm234_vm3 = vweird.f32 %v586_v8  ;;  %vm389_vm4 = vweird.f32 %v592_v18 }
  0xce   :  { %v316_v5 = vadd.s32 %v315_v35, %v306_v33  ;;  %v338_v26 = vadd.s32 %v337_v7, %v328_v6  ;;  %v216_v6 = vsel %vm93_vm7, %v215_v3, %v683_v30 }
  0xcf   :  { %vm436_vm5 = vcmp.lt.s32.totalorder %v435_v19, 0 }
  0xd0   :  { %v200_v10 = vsel %vm436_vm5, 0, %v435_v19  ;;  %vm341_vm6 = vc.u32 %v316_v5, %v335_v29  ;;  %v342_v14 = vadd.s32 1, %v338_v26  ;;  %v340_v51 = vadd.s32 %v335_v29, %v316_v5 }
  0xd1   :  { %v201_v60 = vsub.s32 32, %v200_v10  ;;  %v205_v13 = vsub.s32 4294967266, %v200_v10  ;;  %v202_v15 = vshll.u32 %v193_v48, %v200_v10  ;;  %v218_v10 = vsel %vm708_vm9, 0, %v216_v6 }
  0xd2   :  { %v343_v21 = vsel %vm341_vm6, %v342_v14, %v338_v26 }
  0xd3   :  { %v203_v16 = vshrl.u32 %v185_v11, %v201_v60  ;;  %v206_v17 = vadd.s32 127, %v205_v13  ;;  %v344_v22 = vadd.s32 %v343_v21, %v339_v61 }
  0xd5   :  { %v204_v23 = vor.u32 %v203_v16, %v202_v15  ;;  %v207_v25 = vshll.u32 %v206_v17, 23  ;;  %v345_v46 = vadd.s32 536870912, %v344_v22  ;;  %v235_v16 = vadd.s32 3, %v218_v10 }
  0xd7   :  { %v208_v27 = vor.u32 4788187, %v207_v25  ;;  %v346_v28 = vshrl.u32 %v345_v46, 30  ;;  %v211_v32 = vcvt.s32.f32 %v204_v23 }
  0xd9   :  { %v209_v24 = vand.u32 2147483647, %v208_v27  ;;  %v347_v34 = vshll.u32 %v346_v28, 30  ;;  %v370_v7 = vsub.s32 4, %v346_v28  ;;  %v236_v27 = vand.u32 3, %v235_v16 }
  0xdb   :  { %v212_v37 = vmul.f32 %v211_v32, %v209_v24  ;;  %v348_v49 = vsub.s32 %v344_v22, %v347_v34  ;;  %v371_v13 = vsel %vm248_vm11, %v370_v7, %v346_v28  ;;  %vm238_vm13 = vcmp.eq.s32.totalorder %v236_v27, 0 }
  0xdc   :  { %v373_v30 = vsel %vm721_vm12, 0, %v371_v13  ;;  %vm241_vm14 = vcmp.eq.s32.totalorder %v236_v27, 2  ;;  %vm237_vm15 = vcmp.lt.s32.totalorder %v236_v27, 2 }
  0xdd   :  { %v213_v31 = vxor.u32 2147483648, %v212_v37  ;;  %vm349_vm8 = vcmp.lt.s32.totalorder %v348_v49, 0  ;;  %v350_v12 = vsub.s32 0, %v348_v49  ;;  %v390_v24 = vadd.s32 3, %v373_v30 }
  0xdf   :  { %v214_v39 = vsel %vm93_vm7, %v213_v31, %v212_v37  ;;  %v351_v42 = vsel %vm349_vm8, %v350_v12, %v348_v49  ;;  %v391_v12 = vand.u32 3, %v390_v24 }
  0xe0   :  { %v217_v41 = vsel %vm708_vm9, %v586_v8, %v214_v39  ;;  %v352_v45 = vclz %v351_v42 }
  0xe1   :  { %v219_v44 = vmul.f32 %v217_v41, %v217_v41  ;;  %vm393_vm0 = vcmp.eq.s32.totalorder %v391_v12, 0  ;;  %vm396_vm1 = vcmp.eq.s32.totalorder %v391_v12, 2  ;;  %vm392_vm2 = vcmp.lt.s32.totalorder %v391_v12, 2 }
  0xe2   :  { %v438_v47 = vadd.s32 4294967294, %v352_v45 }
  0xe3   :  { %v227_v48 = vmul.f32 -0.00019511016, %v219_v44  ;;  %v220_v59 = vmul.f32 -0.001358992, %v219_v44 }
  0xe4   :  { %vm439_vm10 = vcmp.lt.s32.totalorder %v438_v47, 0 }
  0xe5   :  { %v355_v50 = vsel %vm439_vm10, 0, %v438_v47  ;;  %v228_v56 = vadd.f32 0.008332121, %v227_v48  ;;  %v221_v1 = vadd.f32 0.041655596, %v220_v59 }
  0xe6   :  { %v356_v52 = vsub.s32 32, %v355_v50  ;;  %v360_v9 = vsub.s32 4294967266, %v355_v50  ;;  %v357_v53 = vshll.u32 %v348_v49, %v355_v50 }
  0xe7   :  { %v229_v63 = vmul.f32 %v228_v56, %v219_v44  ;;  %v222_v40 = vmul.f32 %v221_v1, %v219_v44 }
  0xe8   :  { %v358_v54 = vshrl.u32 %v340_v51, %v356_v52  ;;  %v361_v55 = vadd.s32 127, %v360_v9 }
  0xe9   :  { %v230_v35 = vadd.f32 -0.16666654, %v229_v63  ;;  %v223_v26 = vadd.f32 -0.4999988, %v222_v40 }
  0xea   :  { %v359_v57 = vor.u32 %v358_v54, %v357_v53  ;;  %v362_v58 = vshll.u32 %v361_v55, 23 }
  0xeb   :  { %v231_v5 = vmul.f32 %v230_v35, %v219_v44  ;;  %v224_v14 = vmul.f32 %v223_v26, %v219_v44 }
  0xec   :  { %v363_v62 = vor.u32 4788187, %v362_v58  ;;  %v366_v33 = vcvt.s32.f32 %v359_v57 }
  0xed   :  { %v232_v20 = vadd.f32 1.0, %v231_v5  ;;  %v225_v23 = vadd.f32 1.0, %v224_v14 }
  0xee   :  { %v364_v0 = vand.u32 2147483647, %v363_v62 }
  0xef   :  { %v233_v17 = vmul.f32 %v232_v20, %v217_v41  ;;  %v242_v49 = vxor.u32 2147483648, %v225_v23 }
  0xf0   :  { %v367_v2 = vmul.f32 %v366_v33, %v364_v0 }
  0xf1   :  { %v239_v32 = vxor.u32 2147483648, %v233_v17  ;;  %v243_v42 = vsel %vm241_vm14, %v242_v49, %v233_v17 }
  0xf2   :  { %v368_v4 = vxor.u32 2147483648, %v367_v2 }
  0xf3   :  { %v240_v38 = vsel %vm238_vm13, %v225_v23, %v239_v32 }
  0xf4   :  { %v369_v19 = vsel %vm248_vm11, %v368_v4, %v367_v2  ;;  %v244_v45 = vsel %vm237_vm15, %v240_v38, %v243_v42 }
  0xf5   :  { %v372_v29 = vsel %vm721_vm12, %v592_v18, %v369_v19  ;;  %v245_v51 = vsel %vm234_vm3, nan, %v244_v45 }
  0xf6   :  { %v374_v36 = vmul.f32 %v372_v29, %v372_v29 }
  0xf8   :  { %v375_v11 = vmul.f32 -0.001358992, %v374_v36  ;;  %v382_v60 = vmul.f32 -0.00019511016, %v374_v36 }
  0xfa   :  { %v376_v61 = vadd.f32 0.041655596, %v375_v11  ;;  %v383_v15 = vadd.f32 0.008332121, %v382_v60 }
  0xfc   :  { %v377_v21 = vmul.f32 %v376_v61, %v374_v36  ;;  %v384_v22 = vmul.f32 %v383_v15, %v374_v36 }
  0xfe   :  { %v378_v25 = vadd.f32 -0.4999988, %v377_v21  ;;  %v385_v46 = vadd.f32 -0.16666654, %v384_v22 }
 0x100   :  { %v379_v34 = vmul.f32 %v378_v25, %v374_v36  ;;  %v386_v37 = vmul.f32 %v385_v46, %v374_v36 }
 0x102   :  { %v380_v28 = vadd.f32 1.0, %v379_v34  ;;  %v387_v31 = vadd.f32 1.0, %v386_v37 }
 0x104   :  { %v388_v39 = vmul.f32 %v387_v31, %v372_v29  ;;  %v397_v41 = vxor.u32 2147483648, %v380_v28 }
 0x106   :  { %v394_v44 = vxor.u32 2147483648, %v388_v39  ;;  %v398_v48 = vsel %vm396_vm1, %v397_v41, %v388_v39 }
 0x108   :  { %v395_v47 = vsel %vm393_vm0, %v380_v28, %v394_v44 }
 0x109   :  { %v399_v50 = vsel %vm392_vm2, %v395_v47, %v398_v48 }
 0x10a   :  { %v400_v52 = vsel %vm389_vm4, nan, %v399_v50 }
 0x10b   :  { %v445_v9 = vpack.c.bf16 %v400_v52, %v245_v51 }
 0x10d   :  { %446 = vst [vmem:[#allocation7] sm:$0xff] %v445_v9  }
 0x10e   :  { %417 = dma.vmem_to_hbm [thread:$0]  %s410_s26, 128, %s412_s29, [#allocation4], %s544_s24, %s544_s24, %s545_s25  }
 0x10f   :  { %538 = dma.done.wait [#allocation4], 128  }
 0x110   :  { %539 = vsyncadd [#allocation4], 4294967168 }
 0x111   :  { %422 = vsyncpa [#allocation3], 1 }
 0x112   :  { %423 = vsyncpa [#allocation6], 1 }
 0x113   :  { %424 = vsyncpa [#allocation4], 1 }

// kernel: tpu_custom_call.1
= control target key start
LH: loop header
LB: loop body
LE: loop exit
PB: predicated region body
PF: predicated region fallthrough
CT: control target
= control target key end

     0   :  { %8 = vsyncpa [#allocation3], 0  ;;  %s743_s0 = inlined_call_operand.hbm [shape: f32[16,32], index: 0, kind: input, shape index: {}]   ;;  %s744_s1 = inlined_call_operand.hbm [shape: bf16[32,128], index: 1, kind: input, shape index: {}]   ;;  %s745_s2 = inlined_call_operand.vmem [shape: f32[1,128], index: 2, kind: input, shape index: {}]   ;;  %s746_s3 = inlined_call_operand.hbm [shape: bf16[16,128], index: 3, kind: output, shape index: {}]  }
   0x1   :  { %9 = vsyncpa [#allocation6], 0 }
   0x2   :  { %10 = vsyncpa [#allocation4], 0  ;;  %s15_s14 = sshll.u32 %s743_s0, 4  ;;  %s540_s15 = smov [#allocation2]   ;;  %s16_s14 = int_to_ptr.hbm [resolvable:$true] %s15_s14 }
   0x3   :  { %s17_s16 = sshll.u32 %s540_s15, 4  ;;  %s28_s19 = sshll.u32 %s744_s1, 4  ;;  %s18_s16 = int_to_ptr.vmem [resolvable:$true] %s17_s16  ;;  %s29_s19 = int_to_ptr.hbm [resolvable:$true] %s28_s19 }
   0x4   :  { %s541_s20 = smov 128   ;;  %s542_s21 = smov 8  }
   0x5   :  { %23 = dma.hbm_to_vmem [thread:$0]  %s16_s14, 256, %s18_s16, [#allocation3], %s541_s20, %s541_s20, %s542_s21  }
   0x6   :  { %s543_s22 = smov [#allocation5]   ;;  %s544_s24 = smov 64  }
   0x7   :  { %s30_s23 = sshll.u32 %s543_s22, 4  ;;  %s545_s25 = smov 4   ;;  %s31_s23 = int_to_ptr.vmem [resolvable:$true] %s30_s23 }
   0x8   :  { %36 = dma.hbm_to_vmem [thread:$0]  %s29_s19, 256, %s31_s23, [#allocation6], %s544_s24, %s544_s24, %s545_s25  }
   0x9   :  { %534 = dma.done.wait [#allocation3], 256  }
   0xa   :  { %535 = vsyncadd [#allocation3], 4294967040 }
   0xb   :  { %536 = dma.done.wait [#allocation6], 256  }
   0xc   :  { %537 = vsyncadd [#allocation6], 4294967040  ;;  %v441_v0 = vld [vmem:[#allocation5 + $0x8] sm:$0xff]  ;;  %v440_v1 = vld [vmem:[#allocation5] sm:$0xff]  ;;  %vm71_vm0 = vcmask 261120   ;;  %s411_s29 = sshll.u32 %s746_s3, 4  ;;  %s412_s29 = int_to_ptr.hbm [resolvable:$true] %s411_s29 }
   0xd   :  { %81 = vmatpush.bf16.msra.mxu0 %v441_v0  ;;  %v48_v2 = vld [vmem:[#allocation2] sm:$0xff]  ;;  %v49_v3 = vld [vmem:[#allocation2 + $0x8] sm:$0xff]  ;;  %v546_v29 = vmov 683565275   ;;  %v547_v31 = vmov 2475754826  }
   0xe   :  { %v50_v4 = vpack.c.bf16 %v49_v3, %v48_v2  ;;  %v461_v5 = vld [vmem:[%s745_s2] ss:$0 sm:$0xff]  ;;  %v548_v33 = vmov 2131351028   ;;  %v549_v35 = vmov 2102212464  }
   0xf   :  { %v550_v40 = vmov 920167782   ;;  %v551_v43 = vmov 1326507024   ;;  %s553_s2 = smov [#allocation7]  }
  0x10   :  { %s409_s26 = sshll.u32 %s553_s2, 4  ;;  %s410_s26 = int_to_ptr.vmem [resolvable:$true] %s409_s26 }
  0x11   :  { %82 = vmatpush.bf16.msra.mxu0 %v440_v1 }
  0x14   :  { %433 = vmatmul.msk.bf16.vlgmr.msra.gmra.mxu0 %vm71_vm0, %v50_v4 }
  0x91   :  { %v84_v6 = vpop.f32.mrf.mxu0 }
  0x92   :  { %v85_v7 = vadd.f32 %v461_v5, %v84_v6 }
  0x94   :  { %v586_v8 = vmul.f32 30.0, %v85_v7 }
  0x96   :  { %v91_v9 = vand.u32 2147483647, %v586_v8  ;;  %v94_v10 = vand.u32 2139095040, %v586_v8 }
  0x98   :  { %v95_v11 = vshrl.u32 %v94_v10, 23  ;;  %v98_v12 = vand.u32 8388607, %v91_v9 }
  0x99   :  { %v86_v13 = vpop.f32.mrf.mxu0 }
  0x9a   :  { %v434_v14 = vadd.s32 4294967169, %v95_v11  ;;  %v99_v15 = vor.u32 8388608, %v98_v12  ;;  %v87_v16 = vadd.f32 %v461_v5, %v86_v13 }
  0x9c   :  { %v101_v17 = vadd.s32 1, %v434_v14  ;;  %v592_v18 = vmul.f32 30.0, %v87_v16  ;;  %v594_v19 = vshll.u32 %v99_v15, 8 }
  0x9e   :  { %vm102_vm1 = vcmp.gt.s32.totalorder %v101_v17, 0  ;;  %v246_v20 = vand.u32 2147483647, %v592_v18  ;;  %v249_v22 = vand.u32 2139095040, %v592_v18  ;;  %v140_v26 = vand.u32 65535, %v594_v19 }
  0x9f   :  { %v103_v21 = vsel %vm102_vm1, %v101_v17, 0  ;;  %v141_v1 = vshrl.u32 %v594_v19, 16 }
  0xa0   :  { %v105_v23 = vand.u32 31, %v103_v21  ;;  %v104_v24 = vshrl.u32 %v103_v21, 5  ;;  %v250_v27 = vshrl.u32 %v249_v22, 23  ;;  %v253_v28 = vand.u32 8388607, %v246_v20 }
  0xa2   :  { %v106_v25 = vsub.s32 32, %v105_v23  ;;  %v108_v30 = vshll.u32 %v546_v29, %v105_v23  ;;  %v111_v32 = vshll.u32 %v547_v31, %v105_v23  ;;  %v114_v34 = vshll.u32 %v548_v33, %v105_v23 }
  0xa3   :  { %v117_v36 = vshll.u32 %v549_v35, %v105_v23  ;;  %v120_v41 = vshll.u32 %v550_v40, %v105_v23  ;;  %vm123_vm2 = vcmp.lt.s32.totalorder %v104_v24, 1  ;;  %vm124_vm3 = vcmp.lt.s32.totalorder %v104_v24, 2 }
  0xa4   :  { %v109_v37 = vshrl.u32 %v547_v31, %v106_v25  ;;  %v112_v38 = vshrl.u32 %v548_v33, %v106_v25  ;;  %v115_v39 = vshrl.u32 %v549_v35, %v106_v25  ;;  %v118_v42 = vshrl.u32 %v550_v40, %v106_v25 }
  0xa5   :  { %v121_v44 = vshrl.u32 %v551_v43, %v106_v25  ;;  %v437_v48 = vadd.s32 4294967169, %v250_v27  ;;  %v107_v49 = vshrl.u32 %v546_v29, %v106_v25  ;;  %vm126_vm4 = vcmp.lt.s32.totalorder %v104_v24, 4 }
  0xa6   :  { %v110_v45 = vor.u32 %v109_v37, %v108_v30  ;;  %v113_v46 = vor.u32 %v112_v38, %v111_v32  ;;  %v116_v47 = vor.u32 %v115_v39, %v114_v34  ;;  %v119_v50 = vor.u32 %v118_v42, %v117_v36 }
  0xa7   :  { %v122_v51 = vor.u32 %v121_v44, %v120_v41  ;;  %vm125_vm5 = vcmp.lt.s32.totalorder %v104_v24, 3  ;;  %v254_v57 = vor.u32 8388608, %v253_v28  ;;  %v256_v58 = vadd.s32 1, %v437_v48 }
  0xa8   :  { %v128_v52 = vsel %vm126_vm4, %v116_v47, 2102212464  ;;  %v131_v53 = vsel %vm123_vm2, %v110_v45, %v113_v46  ;;  %v135_v54 = vsel %vm123_vm2, %v113_v46, %v116_v47  ;;  %v132_v55 = vsel %vm126_vm4, %v119_v50, 920167782 }
  0xa9   :  { %v136_v56 = vsel %vm126_vm4, %v122_v51, 1326507024  ;;  %v127_v59 = vsel %vm123_vm2, %v107_v49, %v110_v45  ;;  %v129_v60 = vsel %vm125_vm5, %v113_v46, %v128_v52  ;;  %v133_v61 = vsel %vm125_vm5, %v116_v47, %v132_v55 }
  0xaa   :  { %v137_v62 = vsel %vm125_vm5, %v119_v50, %v136_v56  ;;  %v134_v63 = vsel %vm124_vm3, %v131_v53, %v133_v61  ;;  %vm257_vm6 = vcmp.gt.s32.totalorder %v256_v58, 0  ;;  %v619_v6 = vsel %vm124_vm3, %v127_v59, %v129_v60 }
  0xab   :  { %v138_v0 = vsel %vm124_vm3, %v135_v54, %v137_v62  ;;  %v164_v4 = vand.u32 65535, %v134_v63  ;;  %v165_v5 = vshrl.u32 %v134_v63, 16  ;;  %v258_v11 = vsel %vm257_vm6, %v256_v58, 0 }
  0xac   :  { %v142_v2 = vand.u32 65535, %v138_v0  ;;  %v143_v3 = vshrl.u32 %v138_v0, 16  ;;  %v621_v12 = vshll.u32 %v254_v57, 8  ;;  %v260_v34 = vand.u32 31, %v258_v11 }
  0xad   :  { %v167_v15 = vmul.u32 %v165_v5, %v140_v26  ;;  %v168_v16 = vmul.u32 %v164_v4, %v141_v1  ;;  %v166_v22 = vmul.u32 %v164_v4, %v140_v26  ;;  %v169_v23 = vmul.u32 %v165_v5, %v141_v1 }
  0xae   :  { %v145_v7 = vmul.u32 %v143_v3, %v140_v26  ;;  %v146_v10 = vmul.u32 %v142_v2, %v141_v1  ;;  %v144_v13 = vmul.u32 %v142_v2, %v140_v26  ;;  %v147_v14 = vmul.u32 %v143_v3, %v141_v1 }
  0xaf   :  { %v170_v28 = vshll.u32 %v167_v15, 16  ;;  %v171_v30 = vshrl.u32 %v167_v15, 16  ;;  %v172_v32 = vshll.u32 %v168_v16, 16  ;;  %v552_v36 = vmov 0  }
  0xb0   :  { %v148_v17 = vshll.u32 %v145_v7, 16  ;;  %v149_v21 = vshrl.u32 %v145_v7, 16  ;;  %v150_v25 = vshll.u32 %v146_v10, 16  ;;  %v151_v27 = vshrl.u32 %v146_v10, 16 }
  0xb1   :  { %v173_v38 = vshrl.u32 %v168_v16, 16  ;;  %vm174_vm8 = vc.u32 %v166_v22, %v170_v28  ;;  %v176_v39 = vadd.s32 %v170_v28, %v166_v22  ;;  %v625_v26 = vsub.s32 32, %v260_v34 }
  0xb2   :  { %vm152_vm7 = vc.u32 %v144_v13, %v148_v17  ;;  %v154_v24 = vadd.s32 %v148_v17, %v144_v13  ;;  %v175_v42 = vsel %vm174_vm8, 1, %v552_v36  ;;  %v628_v46 = vshrl.u32 %v258_v11, 5 }
  0xb3   :  { %v153_v37 = vsel %vm152_vm7, 1, %v552_v36  ;;  %v177_v45 = vadd.s32 %v175_v42, %v169_v23  ;;  %vm178_vm10 = vc.u32 %v176_v39, %v172_v32  ;;  %v631_v49 = vadd.s32 %v176_v39, %v172_v32 }
  0xb4   :  { %v155_v41 = vadd.s32 %v153_v37, %v147_v14  ;;  %vm156_vm9 = vc.u32 %v154_v24, %v150_v25  ;;  %v179_v48 = vsel %vm178_vm10, 1, %v552_v36  ;;  %v263_v50 = vshll.u32 %v546_v29, %v260_v34 }
  0xb5   :  { %v157_v44 = vsel %vm156_vm9, 1, %v552_v36  ;;  %v181_v51 = vadd.s32 %v179_v48, %v177_v45  ;;  %v264_v52 = vshrl.u32 %v547_v31, %v625_v26  ;;  %v266_v53 = vshll.u32 %v547_v31, %v260_v34 }
  0xb6   :  { %v159_v47 = vadd.s32 %v157_v44, %v155_v41  ;;  %v267_v54 = vshrl.u32 %v548_v33, %v625_v26  ;;  %v269_v56 = vshll.u32 %v548_v33, %v260_v34  ;;  %v270_v57 = vshrl.u32 %v549_v35, %v625_v26 }
  0xb7   :  { %v272_v58 = vshll.u32 %v549_v35, %v260_v34  ;;  %v182_v59 = vadd.s32 %v181_v51, %v171_v30  ;;  %v643_v60 = vor.u32 %v264_v52, %v263_v50  ;;  %v273_v62 = vshrl.u32 %v550_v40, %v625_v26 }
  0xb8   :  { %v160_v55 = vadd.s32 %v159_v47, %v149_v21  ;;  %v645_v61 = vor.u32 %v267_v54, %v266_v53  ;;  %v271_v63 = vor.u32 %v270_v57, %v269_v56  ;;  %v275_v0 = vshll.u32 %v550_v40, %v260_v34 }
  0xb9   :  { %v276_v33 = vshrl.u32 %v551_v43, %v625_v26  ;;  %v183_v1 = vadd.s32 %v182_v59, %v173_v38  ;;  %v274_v2 = vor.u32 %v273_v62, %v272_v58  ;;  %v184_v35 = vmul.u32 %v594_v19, %v619_v6 }
  0xba   :  { %v649_v31 = vadd.s32 %v160_v55, %v151_v27  ;;  %vm278_vm12 = vcmp.lt.s32.totalorder %v628_v46, 1  ;;  %vm281_vm13 = vcmp.lt.s32.totalorder %v628_v46, 4  ;;  %v295_v43 = vand.u32 65535, %v621_v12 }
  0xbb   :  { %v277_v3 = vor.u32 %v276_v33, %v275_v0  ;;  %v187_v4 = vadd.s32 1, %v183_v1  ;;  %v286_v40 = vsel %vm278_vm12, %v643_v60, %v645_v61  ;;  %vm280_vm14 = vcmp.lt.s32.totalorder %v628_v46, 3 }
  0xbc   :  { %vm186_vm11 = vc.u32 %v649_v31, %v631_v49  ;;  %v287_v19 = vsel %vm281_vm13, %v274_v2, 920167782  ;;  %v290_v5 = vsel %vm278_vm12, %v645_v61, %v271_v63  ;;  %vm279_vm15 = vcmp.lt.s32.totalorder %v628_v46, 2 }
  0xbd   :  { %v291_v6 = vsel %vm281_vm13, %v277_v3, 1326507024  ;;  %v188_v7 = vsel %vm186_vm11, %v187_v4, %v183_v1  ;;  %v288_v10 = vsel %vm280_vm14, %v271_v63, %v287_v19  ;;  %v296_v16 = vshrl.u32 %v621_v12, 16 }
  0xbe   :  { %v292_v11 = vsel %vm280_vm14, %v274_v2, %v291_v6  ;;  %v189_v13 = vadd.s32 %v188_v7, %v184_v35  ;;  %v289_v14 = vsel %vm279_vm15, %v286_v40, %v288_v10  ;;  %v283_v39 = vsel %vm281_vm13, %v271_v63, 2102212464 }
  0xbf   :  { %v293_v15 = vsel %vm279_vm15, %v290_v5, %v292_v11  ;;  %v319_v22 = vand.u32 65535, %v289_v14  ;;  %v320_v23 = vshrl.u32 %v289_v14, 16  ;;  %v262_v0 = vshrl.u32 %v546_v29, %v625_v26 }
  0xc0   :  { %v297_v17 = vand.u32 65535, %v293_v15  ;;  %v298_v21 = vshrl.u32 %v293_v15, 16  ;;  %v190_v25 = vadd.s32 536870912, %v189_v13  ;;  %v185_v11 = vadd.s32 %v631_v49, %v649_v31 }
  0xc1   :  { %v322_v24 = vmul.u32 %v320_v23, %v295_v43  ;;  %v323_v32 = vmul.u32 %v319_v22, %v296_v16  ;;  %v321_v47 = vmul.u32 %v319_v22, %v295_v43  ;;  %v324_v51 = vmul.u32 %v320_v23, %v296_v16 }
  0xc2   :  { %v300_v27 = vmul.u32 %v298_v21, %v295_v43  ;;  %v301_v28 = vmul.u32 %v297_v17, %v296_v16  ;;  %v683_v30 = vshrl.u32 %v190_v25, 30  ;;  %v299_v34 = vmul.u32 %v297_v17, %v295_v43 }
  0xc3   :  { %v302_v41 = vmul.u32 %v298_v21, %v296_v16  ;;  %v325_v42 = vshll.u32 %v322_v24, 16  ;;  %v327_v52 = vshll.u32 %v323_v32, 16  ;;  %v326_v3 = vshrl.u32 %v322_v24, 16 }
  0xc4   :  { %v303_v37 = vshll.u32 %v300_v27, 16  ;;  %v192_v38 = vshll.u32 %v683_v30, 30  ;;  %v305_v44 = vshll.u32 %v301_v28, 16  ;;  %v304_v58 = vshrl.u32 %v300_v27, 16 }
  0xc5   :  { %vm329_vm2 = vc.u32 %v321_v47, %v325_v42  ;;  %v331_v54 = vadd.s32 %v325_v42, %v321_v47  ;;  %v306_v33 = vshrl.u32 %v301_v28, 16  ;;  %v282_v40 = vsel %vm278_vm12, %v262_v0, %v643_v60 }
  0xc6   :  { %vm307_vm0 = vc.u32 %v299_v34, %v303_v37  ;;  %v309_v45 = vadd.s32 %v303_v37, %v299_v34  ;;  %v193_v48 = vsub.s32 %v189_v13, %v192_v38  ;;  %v330_v57 = vsel %vm329_vm2, 1, %v552_v36 }
  0xc7   :  { %v308_v50 = vsel %vm307_vm0, 1, %v552_v36  ;;  %v332_v62 = vadd.s32 %v330_v57, %v324_v51  ;;  %vm333_vm4 = vc.u32 %v331_v54, %v327_v52  ;;  %v284_v43 = vsel %vm280_vm14, %v645_v61, %v283_v39 }
  0xc8   :  { %v310_v53 = vadd.s32 %v308_v50, %v302_v41  ;;  %vm311_vm1 = vc.u32 %v309_v45, %v305_v44  ;;  %vm194_vm3 = vcmp.lt.s32.totalorder %v193_v48, 0  ;;  %v195_v55 = vsub.s32 0, %v193_v48 }
  0xc9   :  { %v312_v56 = vsel %vm311_vm1, 1, %v552_v36  ;;  %v334_v1 = vsel %vm333_vm4, 1, %v552_v36  ;;  %v328_v6 = vshrl.u32 %v323_v32, 16  ;;  %v335_v29 = vadd.s32 %v331_v54, %v327_v52 }
  0xca   :  { %v314_v59 = vadd.s32 %v312_v56, %v310_v53  ;;  %v196_v63 = vsel %vm194_vm3, %v195_v55, %v193_v48  ;;  %v336_v4 = vadd.s32 %v334_v1, %v332_v62  ;;  %v285_v36 = vsel %vm279_vm15, %v282_v40, %v284_v43 }
  0xcb   :  { %v197_v2 = vclz %v196_v63  ;;  %v339_v61 = vmul.u32 %v621_v12, %v285_v36  ;;  %vm93_vm7 = vcmp.lt.s32.totalorder %v586_v8, 0  ;;  %vm708_vm9 = vcmp.le.f32.partialorder %v91_v9, 0.7853982 }
  0xcc   :  { %v315_v35 = vadd.s32 %v314_v59, %v304_v58  ;;  %v337_v7 = vadd.s32 %v336_v4, %v326_v3  ;;  %v215_v3 = vsub.s32 4, %v683_v30  ;;  %vm248_vm11 = vcmp.lt.s32.totalorder %v592_v18, 0 }
  0xcd   :  { %v435_v19 = vadd.s32 4294967294, %v197_v2  ;;  %vm721_vm12 = vcmp.le.f32.partialorder %v246_v20, 0.7853982  ;;  %vm234_vm3 = vweird.f32 %v586_v8  ;;  %vm389_vm4 = vweird.f32 %v592_v18 }
  0xce   :  { %v316_v5 = vadd.s32 %v315_v35, %v306_v33  ;;  %v338_v26 = vadd.s32 %v337_v7, %v328_v6  ;;  %v216_v6 = vsel %vm93_vm7, %v215_v3, %v683_v30 }
  0xcf   :  { %vm436_vm5 = vcmp.lt.s32.totalorder %v435_v19, 0 }
  0xd0   :  { %v200_v10 = vsel %vm436_vm5, 0, %v435_v19  ;;  %vm341_vm6 = vc.u32 %v316_v5, %v335_v29  ;;  %v342_v14 = vadd.s32 1, %v338_v26  ;;  %v340_v51 = vadd.s32 %v335_v29, %v316_v5 }
  0xd1   :  { %v201_v60 = vsub.s32 32, %v200_v10  ;;  %v205_v13 = vsub.s32 4294967266, %v200_v10  ;;  %v202_v15 = vshll.u32 %v193_v48, %v200_v10  ;;  %v218_v10 = vsel %vm708_vm9, 0, %v216_v6 }
  0xd2   :  { %v343_v21 = vsel %vm341_vm6, %v342_v14, %v338_v26 }
  0xd3   :  { %v203_v16 = vshrl.u32 %v185_v11, %v201_v60  ;;  %v206_v17 = vadd.s32 127, %v205_v13  ;;  %v344_v22 = vadd.s32 %v343_v21, %v339_v61 }
  0xd5   :  { %v204_v23 = vor.u32 %v203_v16, %v202_v15  ;;  %v207_v25 = vshll.u32 %v206_v17, 23  ;;  %v345_v46 = vadd.s32 536870912, %v344_v22  ;;  %v235_v16 = vadd.s32 3, %v218_v10 }
  0xd7   :  { %v208_v27 = vor.u32 4788187, %v207_v25  ;;  %v346_v28 = vshrl.u32 %v345_v46, 30  ;;  %v211_v32 = vcvt.s32.f32 %v204_v23 }
  0xd9   :  { %v209_v24 = vand.u32 2147483647, %v208_v27  ;;  %v347_v34 = vshll.u32 %v346_v28, 30  ;;  %v370_v7 = vsub.s32 4, %v346_v28  ;;  %v236_v27 = vand.u32 3, %v235_v16 }
  0xdb   :  { %v212_v37 = vmul.f32 %v211_v32, %v209_v24  ;;  %v348_v49 = vsub.s32 %v344_v22, %v347_v34  ;;  %v371_v13 = vsel %vm248_vm11, %v370_v7, %v346_v28  ;;  %vm238_vm13 = vcmp.eq.s32.totalorder %v236_v27, 0 }
  0xdc   :  { %v373_v30 = vsel %vm721_vm12, 0, %v371_v13  ;;  %vm241_vm14 = vcmp.eq.s32.totalorder %v236_v27, 2  ;;  %vm237_vm15 = vcmp.lt.s32.totalorder %v236_v27, 2 }
  0xdd   :  { %v213_v31 = vxor.u32 2147483648, %v212_v37  ;;  %vm349_vm8 = vcmp.lt.s32.totalorder %v348_v49, 0  ;;  %v350_v12 = vsub.s32 0, %v348_v49  ;;  %v390_v24 = vadd.s32 3, %v373_v30 }
  0xdf   :  { %v214_v39 = vsel %vm93_vm7, %v213_v31, %v212_v37  ;;  %v351_v42 = vsel %vm349_vm8, %v350_v12, %v348_v49  ;;  %v391_v12 = vand.u32 3, %v390_v24 }
  0xe0   :  { %v217_v41 = vsel %vm708_vm9, %v586_v8, %v214_v39  ;;  %v352_v45 = vclz %v351_v42 }
  0xe1   :  { %v219_v44 = vmul.f32 %v217_v41, %v217_v41  ;;  %vm393_vm0 = vcmp.eq.s32.totalorder %v391_v12, 0  ;;  %vm396_vm1 = vcmp.eq.s32.totalorder %v391_v12, 2  ;;  %vm392_vm2 = vcmp.lt.s32.totalorder %v391_v12, 2 }
  0xe2   :  { %v438_v47 = vadd.s32 4294967294, %v352_v45 }
  0xe3   :  { %v227_v48 = vmul.f32 -0.00019511016, %v219_v44  ;;  %v220_v59 = vmul.f32 -0.001358992, %v219_v44 }
  0xe4   :  { %vm439_vm10 = vcmp.lt.s32.totalorder %v438_v47, 0 }
  0xe5   :  { %v355_v50 = vsel %vm439_vm10, 0, %v438_v47  ;;  %v228_v56 = vadd.f32 0.008332121, %v227_v48  ;;  %v221_v1 = vadd.f32 0.041655596, %v220_v59 }
  0xe6   :  { %v356_v52 = vsub.s32 32, %v355_v50  ;;  %v360_v9 = vsub.s32 4294967266, %v355_v50  ;;  %v357_v53 = vshll.u32 %v348_v49, %v355_v50 }
  0xe7   :  { %v229_v63 = vmul.f32 %v228_v56, %v219_v44  ;;  %v222_v40 = vmul.f32 %v221_v1, %v219_v44 }
  0xe8   :  { %v358_v54 = vshrl.u32 %v340_v51, %v356_v52  ;;  %v361_v55 = vadd.s32 127, %v360_v9 }
  0xe9   :  { %v230_v35 = vadd.f32 -0.16666654, %v229_v63  ;;  %v223_v26 = vadd.f32 -0.4999988, %v222_v40 }
  0xea   :  { %v359_v57 = vor.u32 %v358_v54, %v357_v53  ;;  %v362_v58 = vshll.u32 %v361_v55, 23 }
  0xeb   :  { %v231_v5 = vmul.f32 %v230_v35, %v219_v44  ;;  %v224_v14 = vmul.f32 %v223_v26, %v219_v44 }
  0xec   :  { %v363_v62 = vor.u32 4788187, %v362_v58  ;;  %v366_v33 = vcvt.s32.f32 %v359_v57 }
  0xed   :  { %v232_v20 = vadd.f32 1.0, %v231_v5  ;;  %v225_v23 = vadd.f32 1.0, %v224_v14 }
  0xee   :  { %v364_v0 = vand.u32 2147483647, %v363_v62 }
  0xef   :  { %v233_v17 = vmul.f32 %v232_v20, %v217_v41  ;;  %v242_v49 = vxor.u32 2147483648, %v225_v23 }
  0xf0   :  { %v367_v2 = vmul.f32 %v366_v33, %v364_v0 }
  0xf1   :  { %v239_v32 = vxor.u32 2147483648, %v233_v17  ;;  %v243_v42 = vsel %vm241_vm14, %v242_v49, %v233_v17 }
  0xf2   :  { %v368_v4 = vxor.u32 2147483648, %v367_v2 }
  0xf3   :  { %v240_v38 = vsel %vm238_vm13, %v225_v23, %v239_v32 }
  0xf4   :  { %v369_v19 = vsel %vm248_vm11, %v368_v4, %v367_v2  ;;  %v244_v45 = vsel %vm237_vm15, %v240_v38, %v243_v42 }
  0xf5   :  { %v372_v29 = vsel %vm721_vm12, %v592_v18, %v369_v19  ;;  %v245_v51 = vsel %vm234_vm3, nan, %v244_v45 }
  0xf6   :  { %v374_v36 = vmul.f32 %v372_v29, %v372_v29 }
  0xf8   :  { %v375_v11 = vmul.f32 -0.001358992, %v374_v36  ;;  %v382_v60 = vmul.f32 -0.00019511016, %v374_v36 }
  0xfa   :  { %v376_v61 = vadd.f32 0.041655596, %v375_v11  ;;  %v383_v15 = vadd.f32 0.008332121, %v382_v60 }
  0xfc   :  { %v377_v21 = vmul.f32 %v376_v61, %v374_v36  ;;  %v384_v22 = vmul.f32 %v383_v15, %v374_v36 }
  0xfe   :  { %v378_v25 = vadd.f32 -0.4999988, %v377_v21  ;;  %v385_v46 = vadd.f32 -0.16666654, %v384_v22 }
 0x100   :  { %v379_v34 = vmul.f32 %v378_v25, %v374_v36  ;;  %v386_v37 = vmul.f32 %v385_v46, %v374_v36 }
 0x102   :  { %v380_v28 = vadd.f32 1.0, %v379_v34  ;;  %v387_v31 = vadd.f32 1.0, %v386_v37 }
 0x104   :  { %v388_v39 = vmul.f32 %v387_v31, %v372_v29  ;;  %v397_v41 = vxor.u32 2147483648, %v380_v28 }
 0x106   :  { %v394_v44 = vxor.u32 2147483648, %v388_v39  ;;  %v398_v48 = vsel %vm396_vm1, %v397_v41, %v388_v39 }
 0x108   :  { %v395_v47 = vsel %vm393_vm0, %v380_v28, %v394_v44 }
 0x109   :  { %v399_v50 = vsel %vm392_vm2, %v395_v47, %v398_v48 }
 0x10a   :  { %v400_v52 = vsel %vm389_vm4, nan, %v399_v50 }
 0x10b   :  { %v445_v9 = vpack.c.bf16 %v400_v52, %v245_v51 }
 0x10d   :  { %446 = vst [vmem:[#allocation7] sm:$0xff] %v445_v9  }
 0x10e   :  { %417 = dma.vmem_to_hbm [thread:$0]  %s410_s26, 128, %s412_s29, [#allocation4], %s544_s24, %s544_s24, %s545_s25  }
 0x10f   :  { %538 = dma.done.wait [#allocation4], 128  }
 0x110   :  { %539 = vsyncadd [#allocation4], 4294967168 }
 0x111   :  { %422 = vsyncpa [#allocation3], 1 }
 0x112   :  { %423 = vsyncpa [#allocation6], 1 }
 0x113   :  { %424 = vsyncpa [#allocation4], 1 }

</bundles_post_ra>
